<compile_context>
chip_gen: v7x
topology: tpu7x:2x2x1
jax: 0.10.0
libtpu: 0.0.40
codegen_flags: <defaults>
</compile_context>

<pallas_src>
import functools

import jax
import jax.numpy as jnp
from jax.experimental import pallas as pl
from jax.experimental.pallas import tpu as pltpu


def _round_up(x: int, m: int) -> int:
    return ((x + m - 1) // m) * m


def _reservoir_kernel(x_ref, wt_ref, o_ref, acc_ref):
    """Computes one (tm, tn) output tile; K is the innermost reduction axis."""
    @pl.when(pl.program_id(2) == 0)
    def _():
        acc_ref[...] = jnp.zeros_like(acc_ref)

    # MXU matmul with f32 accumulation (bf16 inputs).
    acc_ref[...] += jnp.dot(
        x_ref[...], wt_ref[...], preferred_element_type=jnp.float32
    )

    @pl.when(pl.program_id(2) == pl.num_programs(2) - 1)
    def _():
        # f32 tanh on the EUP (free slot next to the MXU), lane-dense store.
        o_ref[...] = jnp.tanh(acc_ref[...]).astype(o_ref.dtype)


def prepare_weight(weight: jax.Array, compute_dtype=jnp.bfloat16) -> jax.Array:
    """Transpose + cast the frozen (reservoir_dim, input_dim) weight ONCE.

    The result, shaped (input_dim, reservoir_dim), should be cached by the
    caller (the reservoir weight never changes), so no per-call HBM transpose
    or cast traffic is paid.
    """
    return jnp.asarray(weight).astype(compute_dtype).T


@functools.partial(jax.jit, static_argnames=("block_m", "block_n", "block_k"))
def reservoir_forward(
    x: jax.Array,
    weight_t: jax.Array,
    *,
    block_m: int = 256,
    block_n: int = 256,
    block_k: int = 512,
) -> jax.Array:
    """Pallas equivalent of Reservoir.forward.

    Args:
      x: (batch, input_dim) or (input_dim,) array.
      weight_t: pre-transposed weight from prepare_weight(),
        shape (input_dim, reservoir_dim), typically bfloat16.

    Returns:
      (batch, reservoir_dim) float32 array: tanh(x @ weight.T)
    """
    x = jnp.asarray(x)
    if x.ndim == 1:
        x = x[None, :]

    compute_dtype = weight_t.dtype
    x = x.astype(compute_dtype)

    batch, input_dim = x.shape
    k_w, reservoir_dim = weight_t.shape
    assert k_w == input_dim, "weight_t must be (input_dim, reservoir_dim)"

    # Tile sizes: sublane dims multiples of 8, lane dims multiples of 128.
    tm = min(block_m, _round_up(batch, 8))
    tk = min(block_k, _round_up(input_dim, 128))
    tn = min(block_n, _round_up(reservoir_dim, 128))

    bp = _round_up(batch, tm)
    kp = _round_up(input_dim, tk)
    np_ = _round_up(reservoir_dim, tn)

    # Zero-pad so every block is full (zeros contribute nothing to the dot;
    # padded output columns/rows are sliced off below).
    if (bp, kp) != (batch, input_dim):
        x = jnp.pad(x, ((0, bp - batch), (0, kp - input_dim)))
    w = weight_t
    if (kp, np_) != (input_dim, reservoir_dim):
        w = jnp.pad(w, ((0, kp - input_dim), (0, np_ - reservoir_dim)))

    grid = (bp // tm, np_ // tn, kp // tk)
    itemsize = jnp.dtype(compute_dtype).itemsize

    out = pl.pallas_call(
        _reservoir_kernel,
        out_shape=jax.ShapeDtypeStruct((bp, np_), jnp.float32),
        grid_spec=pltpu.PrefetchScalarGridSpec(
            num_scalar_prefetch=0,
            grid=grid,
            in_specs=[
                pl.BlockSpec((tm, tk), lambda i, j, k: (i, k)),
                pl.BlockSpec((tk, tn), lambda i, j, k: (k, j)),
            ],
            out_specs=pl.BlockSpec((tm, tn), lambda i, j, k: (i, j)),
            scratch_shapes=[pltpu.VMEM((tm, tn), jnp.float32)],
        ),
        compiler_params=pltpu.CompilerParams(
            dimension_semantics=("parallel", "parallel", "arbitrary"),
            vmem_limit_bytes=64 * 1024 * 1024,
        ),
        cost_estimate=pl.CostEstimate(
            flops=2 * bp * kp * np_,
            transcendentals=bp * np_,
            bytes_accessed=itemsize * (bp * kp + kp * np_) + 4 * bp * np_,
        ),
    )(x, w)

    return out[:batch, :reservoir_dim]


def make_orthogonal_weight(key, reservoir_dim: int, input_dim: int) -> jax.Array:
    """Deterministic orthogonal init matching nn.init.orthogonal_ semantics."""
    rows, cols = reservoir_dim, input_dim
    flat = jax.random.normal(key, (max(rows, cols), min(rows, cols)), jnp.float32)
    q, r = jnp.linalg.qr(flat)
    q = q * jnp.sign(jnp.diagonal(r))[None, :]
    if rows < cols:
        q = q.T
    return q[:rows, :cols]


if __name__ == "__main__":
    key = jax.random.PRNGKey(0)
    k_w, k_x = jax.random.split(key)

    batch = 8
    input_dim = 32
    reservoir_dim = 64  # module default

    weight = make_orthogonal_weight(k_w, reservoir_dim, input_dim)  # (64, 32)
    x = jax.random.normal(k_x, (batch, input_dim), jnp.float32)

    # Frozen reservoir weight: transpose + bf16 cast happen exactly once here.
    weight_t = prepare_weight(weight, compute_dtype=jnp.bfloat16)

    out = reservoir_forward(x, weight_t)
    jax.block_until_ready(out)

    assert out.shape == (batch, reservoir_dim)
    assert out.dtype == jnp.float32

    # Loose check vs. the f32 reference (bf16 MXU inputs, f32 accum + f32 tanh).
    ref_f32 = jnp.tanh(x @ weight.T)
    assert jnp.allclose(out, ref_f32, atol=3e-2, rtol=3e-2)

    # Tight check vs. the bf16-rounded reference.
    ref_bf16 = jnp.tanh(
        x.astype(jnp.bfloat16).astype(jnp.float32)
        @ weight.astype(jnp.bfloat16).astype(jnp.float32).T
    )
    assert jnp.allclose(out, ref_bf16, atol=1e-3, rtol=1e-3)

    # 1-D input promotion path (matches PyTorch's unsqueeze(0)).
    out1 = reservoir_forward(x[0], weight_t)
    jax.block_until_ready(out1)
    assert out1.shape == (1, reservoir_dim)

    # TODO(synk): get_state/set_state serialization is host-side bookkeeping,
    # not a kernel concern.
    print("KERNEL_OK")
</pallas_src>

<mosaic_0001>
module attributes {stable_mosaic.version = 11 : i64} {
  func.func @_reservoir_kernel(%arg0: i32, %arg1: i32, %arg2: i32, %arg3: memref<8x128xbf16, #tpu.memory_space<vmem>>, %arg4: memref<128x128xbf16, #tpu.memory_space<vmem>>, %arg5: memref<8x128xf32, #tpu.memory_space<vmem>>, %arg6: memref<8x128xf32, #tpu.memory_space<vmem>>) attributes {dimension_semantics = [#tpu.dimension_semantics<parallel>, #tpu.dimension_semantics<parallel>, #tpu.dimension_semantics<arbitrary>], iteration_bounds = array<i64: 1, 1, 1>, scalar_prefetch = 0 : i64, scratch_operands = 1 : i64, tpu.core_type = #tpu.core_type<tc>, window_params = [{transform_indices = @transform_0, window_bounds = array<i64: 8, 128>}, {transform_indices = @transform_1, window_bounds = array<i64: 128, 128>}, {transform_indices = @transform_2, window_bounds = array<i64: 8, 128>}]} {
    %c0_i32 = arith.constant 0 : i32
    %0 = arith.cmpi eq, %arg2, %c0_i32 : i32
    %1 = arith.extui %0 : i1 to i32
    %c0_i32_0 = arith.constant 0 : i32
    %2 = arith.cmpi ne, %1, %c0_i32_0 : i32
    scf.if %2 {
      %cst_10 = arith.constant 0.000000e+00 : f32
      %12 = vector.broadcast %cst_10 : f32 to vector<8x128xf32>
      %c0_11 = arith.constant 0 : index
      %c0_12 = arith.constant 0 : index
      %13 = vector.load %arg6[%c0_11, %c0_12] : memref<8x128xf32, #tpu.memory_space<vmem>>, vector<8x128xf32>
      tpu.vector_store %arg6[%c0_11, %c0_12], %12 {strides = array<i32>} : memref<8x128xf32, #tpu.memory_space<vmem>>, vector<8x128xf32>,
    } else {
    }
    %c0 = arith.constant 0 : index
    %c0_1 = arith.constant 0 : index
    %3 = vector.load %arg6[%c0, %c0_1] : memref<8x128xf32, #tpu.memory_space<vmem>>, vector<8x128xf32>
    %c0_2 = arith.constant 0 : index
    %c0_3 = arith.constant 0 : index
    %4 = vector.load %arg3[%c0_2, %c0_3] : memref<8x128xbf16, #tpu.memory_space<vmem>>, vector<8x128xbf16>
    %c0_4 = arith.constant 0 : index
    %c0_5 = arith.constant 0 : index
    %5 = vector.load %arg4[%c0_4, %c0_5] : memref<128x128xbf16, #tpu.memory_space<vmem>>, vector<128x128xbf16>
    %cst = arith.constant dense<0.000000e+00> : vector<8x128xf32>
    %6 = tpu.matmul %4, %5, %cst {dimension_numbers = #tpu.dot_dimension_numbers<[1], [0], [0], [1], [0, 0, 1, 1], [], []>} : vector<8x128xbf16>, vector<128x128xbf16>, vector<8x128xf32> -> vector<8x128xf32>
    %7 = arith.addf %3, %6 : vector<8x128xf32>
    %c0_6 = arith.constant 0 : index
    %c0_7 = arith.constant 0 : index
    %8 = vector.load %arg6[%c0_6, %c0_7] : memref<8x128xf32, #tpu.memory_space<vmem>>, vector<8x128xf32>
    tpu.vector_store %arg6[%c0_6, %c0_7], %7 {strides = array<i32>} : memref<8x128xf32, #tpu.memory_space<vmem>>, vector<8x128xf32>,
    %c0_i32_8 = arith.constant 0 : i32
    %9 = arith.cmpi eq, %arg2, %c0_i32_8 : i32
    %10 = arith.extui %9 : i1 to i32
    %c0_i32_9 = arith.constant 0 : i32
    %11 = arith.cmpi ne, %10, %c0_i32_9 : i32
    scf.if %11 {
      %c0_10 = arith.constant 0 : index
      %c0_11 = arith.constant 0 : index
      %12 = vector.load %arg6[%c0_10, %c0_11] : memref<8x128xf32, #tpu.memory_space<vmem>>, vector<8x128xf32>
      %13 = math.tanh %12 : vector<8x128xf32>
      %c0_12 = arith.constant 0 : index
      %c0_13 = arith.constant 0 : index
      %14 = vector.load %arg5[%c0_12, %c0_13] : memref<8x128xf32, #tpu.memory_space<vmem>>, vector<8x128xf32>
      tpu.vector_store %arg5[%c0_12, %c0_13], %13 {strides = array<i32>} : memref<8x128xf32, #tpu.memory_space<vmem>>, vector<8x128xf32>,
    } else {
    }
    return
  }
  func.func @transform_0(%arg0: i32, %arg1: i32, %arg2: i32) -> (i32, i32) {
    %c0_i32 = arith.constant 0 : i32
    return %arg0, %arg2 : i32, i32
  }
  func.func @transform_1(%arg0: i32, %arg1: i32, %arg2: i32) -> (i32, i32) {
    %c0_i32 = arith.constant 0 : i32
    return %arg2, %arg1 : i32, i32
  }
  func.func @transform_2(%arg0: i32, %arg1: i32, %arg2: i32) -> (i32, i32) {
    %c0_i32 = arith.constant 0 : i32
    return %arg0, %arg1 : i32, i32
  }
}

</mosaic_0001>

<bundles_post_ra>
// kernel: reservoir_forward.1
= control target key start
LH: loop header
LB: loop body
LE: loop exit
PB: predicated region body
PF: predicated region fallthrough
CT: control target
= control target key end

     0   :  { %7 = vsyncpa [#allocation4], 0  ;;  %s365_s0 = inlined_call_operand.hbm [shape: bf16[8,128], index: 0, kind: input, shape index: {}]   ;;  %s366_s1 = inlined_call_operand.hbm [shape: bf16[128,128], index: 1, kind: input, shape index: {}]   ;;  %s367_s2 = inlined_call_operand.hbm [shape: f32[8,128], index: 2, kind: output, shape index: {}]  }
   0x1   :  { %8 = vsyncpa [#allocation7], 0 }
   0x2   :  { %9 = vsyncpa [#allocation5], 0  ;;  %s300_s9 = smov [#allocation3]   ;;  %s301_s11 = smov [#allocation6]  }
   0x3   :  { %s16_s10 = sshll.u32 %s300_s9, 4  ;;  %s25_s12 = sshll.u32 %s301_s11, 4  ;;  %s17_s10 = int_to_ptr.vmem [resolvable:$true] %s16_s10  ;;  %s322_s12 = int_to_ptr.vmem [resolvable:$true] %s25_s12 }
   0x4   :  { %s228_s15 = scalar_lea.hbm %s365_s0, 64 }
   0x5   :  { %p229_p0 = scmp.ne.s32.totalorder %s365_s0, %s228_s15  ;;  %p232_p1 = scmp.lt.u32.totalorder %s228_s15, %s365_s0 }
   0x7   :  { %p234_p2 = pnand %p232_p1, %p229_p0 }
   0x9   :  { %237 = shalt.err (!%p234_p2)
}
   0xa   :  { %s238_s20 = scalar_lea.vmem %s17_s10, 64  ;;  %p243_p4 = scmp.lt.s32.totalorder %s17_s10, %s17_s10 }
   0xb   :  { %p239_p3 = scmp.ne.s32.totalorder %s17_s10, %s238_s20  ;;  %p244_p5 = scmp.lt.s32.totalorder %s238_s20, %s238_s20 }
   0xd   :  { %p245_p6 = por %p244_p5, %p243_p4 }
   0xf   :  { %p246_p7 = pnand %p245_p6, %p239_p3 }
  0x11   :  { %249 = shalt.err (!%p246_p7)
}
  0x12   :  { %19 = dma.hbm_to_vmem [thread:$0]  %s365_s0, 64, %s17_s10, [#allocation4]  }
  0x13   :  { %s250_s25 = scalar_lea.hbm %s366_s1, 1024 }
  0x14   :  { %p251_p8 = scmp.ne.s32.totalorder %s366_s1, %s250_s25  ;;  %p254_p9 = scmp.lt.u32.totalorder %s250_s25, %s366_s1 }
  0x16   :  { %p256_p10 = pnand %p254_p9, %p251_p8 }
  0x18   :  { %259 = shalt.err (!%p256_p10)
}
  0x19   :  { %s260_s30 = scalar_lea.vmem %s322_s12, 1024  ;;  %p265_p12 = scmp.lt.s32.totalorder %s322_s12, %s322_s12 }
  0x1a   :  { %p261_p11 = scmp.ne.s32.totalorder %s322_s12, %s260_s30  ;;  %p266_p13 = scmp.lt.s32.totalorder %s260_s30, %s260_s30 }
  0x1c   :  { %p267_p0 = por %p266_p13, %p265_p12 }
  0x1e   :  { %p268_p1 = pnand %p267_p0, %p261_p11 }
  0x20   :  { %271 = shalt.err (!%p268_p1)
}
  0x21   :  { %s302_s0 = smov 64   ;;  %s303_s3 = smov 4  }
  0x22   :  { %31 = dma.hbm_to_vmem [thread:$0]  %s366_s1, 1024, %s322_s12, [#allocation7], %s302_s0, %s302_s0, %s303_s3  }
  0x23   :  { %294 = dma.done.wait [#allocation4], 64  }
  0x24   :  { %295 = vsyncadd [#allocation4], 4294967232 }
  0x25   :  { %296 = dma.done.wait [#allocation7], 1024  }
  0x26   :  { %297 = vsyncadd [#allocation7], 4294966272  ;;  %v304_v0 = vmov 0.0   ;;  %vm305_vm0 = vmmov 0   ;;  %v218_v1 = vld [vmem:[#allocation6] sm:$0xff]   ;;  %v219_v2 = vld [vmem:[#allocation6 + $0x8] sm:$0xff]  }
  0x27   :  { %191 = vmatprep.subr.bf16.mxu0 %v304_v0  ;;  %207 = vmatprep.mubr.msk.bf16.mxu0 %vm305_vm0, %v304_v0  ;;  %v220_v3 = vld [vmem:[#allocation6 + $0x10] sm:$0xff]   ;;  %v221_v4 = vld [vmem:[#allocation6 + $0x18] sm:$0xff]   ;;  %v222_v5 = vld [vmem:[#allocation6 + $0x20] sm:$0xff]   ;;  %s306_s1 = smov [#allocation8]  }
  0x28   :  { %192 = vmatpush3.bf16.msra.mxu0 %v218_v1  ;;  %v223_v6 = vld [vmem:[#allocation6 + $0x28] sm:$0xff]   ;;  %v224_v7 = vld [vmem:[#allocation6 + $0x30] sm:$0xff]   ;;  %v225_v8 = vld [vmem:[#allocation6 + $0x38] sm:$0xff]   ;;  %s164_s6 = sshll.u32 %s306_s1, 4  ;;  %s165_s6 = int_to_ptr.vmem [resolvable:$true] %s164_s6 }
  0x29   :  { %193 = vmatprep.subr.bf16.mxu0 %v304_v0  ;;  %v45_v9 = vld [vmem:[#allocation3] sm:$0xf]  ;;  %s272_s7 = scalar_lea.vmem %s165_s6, 128  ;;  %p277_p3 = scmp.lt.s32.totalorder %s165_s6, %s165_s6 }
  0x2a   :  { %p273_p2 = scmp.ne.s32.totalorder %s165_s6, %s272_s7  ;;  %p278_p4 = scmp.lt.s32.totalorder %s272_s7, %s272_s7 }
  0x2c   :  { %194 = vmatpush3.bf16.msra.mxu0 %v219_v2  ;;  %p279_p5 = por %p278_p4, %p277_p3 }
  0x2d   :  { %195 = vmatprep.subr.bf16.mxu0 %v304_v0 }
  0x2e   :  { %p280_p6 = pnand %p279_p5, %p273_p2 }
  0x30   :  { %196 = vmatpush3.bf16.msra.mxu0 %v220_v3 }
  0x31   :  { %197 = vmatprep.subr.bf16.mxu0 %v304_v0 }
  0x34   :  { %198 = vmatpush3.bf16.msra.mxu0 %v221_v4 }
  0x35   :  { %199 = vmatprep.subr.bf16.mxu0 %v304_v0 }
  0x38   :  { %200 = vmatpush3.bf16.msra.mxu0 %v222_v5 }
  0x39   :  { %201 = vmatprep.subr.bf16.mxu0 %v304_v0 }
  0x3c   :  { %202 = vmatpush3.bf16.msra.mxu0 %v223_v6 }
  0x3d   :  { %203 = vmatprep.subr.bf16.mxu0 %v304_v0 }
  0x40   :  { %204 = vmatpush3.bf16.msra.mxu0 %v224_v7 }
  0x41   :  { %205 = vmatprep.subr.bf16.mxu0 %v304_v0 }
  0x44   :  { %206 = vmatpush3.bf16.msra.mxu0 %v225_v8 }
  0x47   :  { %208 = vmatmul.mubr.bf16.vlgmr.msra.gmra.mrb[0].mxu0 %v45_v9 }
 0x11a   :  { %v144_v10 = vpop.f32.mrb[0].mxu0 }
 0x11b   :  { %226 = vtanh.f32 %v144_v10  ;;  %v209_v11 = vpop.f32.mrb[1].mxu0 }
 0x11c   :  { %v147_v12 = vpop.f32.mrb[2].mxu0 }
 0x11d   :  { %v210_v13 = vpop.f32.mrb[3].mxu0 }
 0x125   :  { %v227_v14 = vpop.eup %226 }
 0x126   :  { %157 = vst [vmem:[#allocation8] sm:$0xff] %v227_v14 }
 0x127   :  { %283 = shalt.err (!%p280_p6)
}
 0x128   :  { %s284_s10 = scalar_lea.hbm %s367_s2, 128 }
 0x129   :  { %p285_p7 = scmp.ne.s32.totalorder %s367_s2, %s284_s10  ;;  %p288_p8 = scmp.lt.u32.totalorder %s284_s10, %s367_s2 }
 0x12b   :  { %p290_p9 = pnand %p288_p8, %p285_p7 }
 0x12d   :  { %293 = shalt.err (!%p290_p9)
}
 0x12e   :  { %167 = dma.vmem_to_hbm [thread:$0]  %s165_s6, 128, %s367_s2, [#allocation5]  }
 0x12f   :  { %298 = dma.done.wait [#allocation5], 128  }
 0x130   :  { %299 = vsyncadd [#allocation5], 4294967168 }
 0x131   :  { %171 = vsyncpa [#allocation4], 1 }
 0x132   :  { %172 = vsyncpa [#allocation7], 1 }
 0x133   :  { %173 = vsyncpa [#allocation5], 1 }

</bundles_post_ra>
